<compile_context>
chip_gen: v7x
topology: tpu7x:2x2x1
jax: 0.10.0
libtpu: 0.0.40
codegen_flags: <defaults>
</compile_context>

<pallas_src>
import math
from functools import partial

import jax
import jax.numpy as jnp
import numpy as np
from jax import lax
from jax.experimental import pallas as pl
from jax.experimental.pallas import tpu as pltpu


# --------------------------------------------------------------------------- #
# Kernel 1: 1x1 conv (channels matmul) + GroupNorm, tiled over HW, two passes. #
#   grid = (B, pass, hw_tile); pass 0 = stats sweep, pass 1 = normalize+store. #
# --------------------------------------------------------------------------- #
def _src_kernel(x_ref, w_ref, b_ref, g_ref, bt_ref, gid_row_ref, gid_col_ref,
                src_ref, stat_ref, scale_ref, shift_ref, *, num_groups, eps, hw):
    p = pl.program_id(1)          # 0 = stats sweep, 1 = normalize + store sweep
    t = pl.program_id(2)          # HW-tile index
    nt = pl.num_programs(2)

    # 1x1 conv == per-pixel channels matmul on the MXU (bf16 in, f32 acc).
    # NOTE: the conv bias is NOT added per tile; it is folded analytically into
    # the group statistics and the affine shift at finalize time.
    x = x_ref[0]                                                   # (TQ, Cin) bf16
    z = jnp.dot(x, w_ref[...], preferred_element_type=jnp.float32) # (TQ, Cout) f32

    @pl.when(p == 0)
    def _stats_sweep():
        @pl.when(t == 0)
        def _reset():
            stat_ref[...] = jnp.zeros_like(stat_ref)

        s = jnp.sum(z, axis=0, keepdims=True)                      # (1, Cout)
        ss = jnp.sum(z * z, axis=0, keepdims=True)                 # (1, Cout)
        stat_ref[...] += jnp.concatenate([s, ss], axis=0)          # (2, Cout)

        @pl.when(t == nt - 1)
        def _finalize():
            cout = stat_ref.shape[1]
            gs = cout // num_groups
            n = float(hw)
            b = b_ref[...]                                         # (1, Cout)
            s1 = stat_ref[0:1]                                     # sum(z)
            s2 = stat_ref[1:2]                                     # sum(z*z)
            # Fold the conv bias in analytically:  y = z + b
            sum_y = s1 + n * b
            sum_y2 = s2 + 2.0 * b * s1 + n * (b * b)
            # Group indicator built in-kernel from two tiny gid vectors
            # (no (Cout, Cout) constant DMA'd from HBM or resident across steps).
            gmat = (jnp.abs(gid_col_ref[...] - gid_row_ref[...]) < 0.5
                    ).astype(jnp.float32)                          # (Cout, Cout)
            inv_n = 1.0 / (n * gs)
            gstats = jnp.dot(jnp.concatenate([sum_y, sum_y2], axis=0), gmat,
                             preferred_element_type=jnp.float32) * inv_n
            mean = gstats[0:1]                                     # (1, Cout)
            var = jnp.maximum(gstats[1:2] - mean * mean, 0.0)      # guard tiny negatives
            sc = lax.rsqrt(var + eps) * g_ref[...]
            scale_ref[...] = sc
            shift_ref[...] = bt_ref[...] + (b - mean) * sc         # beta + (bias-mean)*sc

    @pl.when(p == 1)
    def _normalize_sweep():
        src_ref[0] = (z * scale_ref[...] + shift_ref[...]).astype(src_ref.dtype)


# --------------------------------------------------------------------------- #
# Kernel 2: batch-invariant sine position embedding, computed & written once.  #
#   angle = y_embed*cy + x_embed*cx + phase ; cos folded in as sin(x + pi/2).  #
# --------------------------------------------------------------------------- #
def _pos_kernel(ye_ref, xe_ref, cy_ref, cx_ref, ph_ref, pos_ref):
    ang = ye_ref[...] * cy_ref[...] + xe_ref[...] * cx_ref[...] + ph_ref[...]
    pos_ref[...] = jnp.sin(ang).astype(pos_ref.dtype)


def _pick_tile(hw, cin, cout, requested=None, vmem_budget=24 * 1024 * 1024):
    if requested is not None:
        assert hw % requested == 0 and (requested % 8 == 0 or requested == hw)
        return requested
    for cand in (2048, 1024, 512, 256, 128, 64, 32, 16, 8):
        if hw % cand == 0:
            # double-buffered x tile (bf16) + double-buffered out tile (f32)
            # + f32 conv temporary must fit the budget.
            work = 2 * (cand * cin * 2) + 2 * (cand * cout * 4) + cand * cout * 4
            if work <= vmem_budget:
                return cand
    return hw   # full-extent block is always a legal block shape


def feat_map_lifter(feat_map, conv_w, conv_b, gn_gamma, gn_beta, *,
                    num_groups=32, gn_eps=1e-5, temperature=10000.0,
                    block_rows=None, broadcast_pos=True):
    """feat_map: (B, Cin, H, W) NCHW.

    Returns (src_flatten, pos).  src_flatten: (B, H*W, Cout).
    pos: (B, H*W, Cout) if broadcast_pos (module-exact shape; rows are identical
    across batch), else the compact (1, H*W, Cout) form that avoids materializing
    B identical copies."""
    B, Cin, H, W = feat_map.shape
    Cout = conv_w.shape[0]
    HW = H * W
    assert Cout % num_groups == 0 and Cout % 2 == 0
    tq = _pick_tile(HW, Cin, Cout, block_rows)
    nt = HW // tq

    # ---- conv + GroupNorm inputs (channels-last; bf16 matmul operands) ----
    # NCHW -> (B, HW, Cin); ordering matches flatten(2).transpose(1, 2).
    x = jnp.transpose(feat_map, (0, 2, 3, 1)).reshape(B, HW, Cin).astype(jnp.bfloat16)
    w2 = conv_w.reshape(Cout, Cin).T.astype(jnp.bfloat16)          # (Cin, Cout)
    b2 = conv_b.reshape(1, Cout).astype(jnp.float32)
    g2 = gn_gamma.reshape(1, Cout).astype(jnp.float32)
    bt2 = gn_beta.reshape(1, Cout).astype(jnp.float32)
    gs = Cout // num_groups
    gid = jnp.arange(Cout, dtype=jnp.float32) // gs                # group id per channel
    gid_row = gid.reshape(1, Cout)
    gid_col = gid.reshape(Cout, 1)

    # Explicit VMEM budget derived from the chosen tile (with headroom),
    # capped at 64 MiB so it stays valid on v7x.
    work = (2 * (tq * Cin * 2) + 2 * (Cin * Cout * 2)
            + 2 * (tq * Cout * 4) + tq * Cout * 4
            + Cout * Cout * 4 + 16 * Cout * 4)
    vmem_limit = int(min(64 * 1024 * 1024, max(4 * work, 32 * 1024 * 1024)))

    kernel = partial(_src_kernel, num_groups=num_groups, eps=gn_eps, hw=HW)
    src = pl.pallas_call(
        kernel,
        out_shape=jax.ShapeDtypeStruct((B, HW, Cout), jnp.float32),
        grid_spec=pltpu.PrefetchScalarGridSpec(
            num_scalar_prefetch=0,
            grid=(B, 2, nt),
            in_specs=[
                pl.BlockSpec((1, tq, Cin), lambda b, p, t: (b, t, 0)),   # x tile
                pl.BlockSpec((Cin, Cout), lambda b, p, t: (0, 0)),       # conv weight
                pl.BlockSpec((1, Cout), lambda b, p, t: (0, 0)),         # conv bias
                pl.BlockSpec((1, Cout), lambda b, p, t: (0, 0)),         # GN gamma
                pl.BlockSpec((1, Cout), lambda b, p, t: (0, 0)),         # GN beta
                pl.BlockSpec((1, Cout), lambda b, p, t: (0, 0)),         # gid (row form)
                pl.BlockSpec((Cout, 1), lambda b, p, t: (0, 0)),         # gid (col form)
            ],
            # Stats sweep (p=0) parks the output on block (b, 0); the block is
            # only written during the normalize sweep (p=1), so every src block
            # is copied back to HBM exactly once, with final data.
            out_specs=pl.BlockSpec((1, tq, Cout), lambda b, p, t: (b, p * t, 0)),
            scratch_shapes=[pltpu.VMEM((2, Cout), jnp.float32),   # per-channel sum/sumsq
                            pltpu.VMEM((1, Cout), jnp.float32),   # per-channel scale
                            pltpu.VMEM((1, Cout), jnp.float32)],  # per-channel shift
        ),
        compiler_params=pltpu.CompilerParams(
            dimension_semantics=("parallel", "arbitrary", "arbitrary"),
            vmem_limit_bytes=vmem_limit),
    )(x, w2, b2, g2, bt2, gid_row, gid_col)

    # ---- batch-invariant sine position embedding (computed & written ONCE) ----
    npf = Cout // 2
    scale = 2.0 * math.pi
    pe_eps = 1e-6
    ye = (jnp.arange(H, dtype=jnp.float32) + 1.0) / (H + pe_eps) * scale
    xe = (jnp.arange(W, dtype=jnp.float32) + 1.0) / (W + pe_eps) * scale
    ye = jnp.broadcast_to(ye[:, None], (H, W)).reshape(HW, 1)      # (HW, 1)
    xe = jnp.broadcast_to(xe[None, :], (H, W)).reshape(HW, 1)      # (HW, 1)
    j = jnp.arange(npf)
    inv_dim = 1.0 / (temperature ** (2.0 * (j // 2).astype(jnp.float32) / npf))
    half_phase = (j % 2).astype(jnp.float32) * (math.pi / 2.0)     # odd ch: cos = sin(.+pi/2)
    zeros = jnp.zeros((npf,), jnp.float32)
    cy = jnp.concatenate([inv_dim, zeros]).reshape(1, Cout)
    cx = jnp.concatenate([zeros, inv_dim]).reshape(1, Cout)
    ph = jnp.concatenate([half_phase, half_phase]).reshape(1, Cout)

    pos1 = pl.pallas_call(
        _pos_kernel,
        out_shape=jax.ShapeDtypeStruct((HW, Cout), jnp.float32),
        grid_spec=pltpu.PrefetchScalarGridSpec(
            num_scalar_prefetch=0,
            grid=(nt,),
            in_specs=[
                pl.BlockSpec((tq, 1), lambda t: (t, 0)),       # y_embed per row
                pl.BlockSpec((tq, 1), lambda t: (t, 0)),       # x_embed per row
                pl.BlockSpec((1, Cout), lambda t: (0, 0)),     # per-channel y coeff
                pl.BlockSpec((1, Cout), lambda t: (0, 0)),     # per-channel x coeff
                pl.BlockSpec((1, Cout), lambda t: (0, 0)),     # per-channel phase
            ],
            out_specs=pl.BlockSpec((tq, Cout), lambda t: (t, 0)),
        ),
        compiler_params=pltpu.CompilerParams(
            dimension_semantics=("parallel",),
            vmem_limit_bytes=vmem_limit),
    )(ye, xe, cy, cx, ph)

    pos = pos1[None]                                   # (1, HW, Cout)
    if broadcast_pos:
        pos = jnp.broadcast_to(pos, (B, HW, Cout))     # module-exact output shape
    return src, pos


def _reference(feat_map, conv_w, conv_b, gn_gamma, gn_beta, num_groups=32,
               gn_eps=1e-5, temperature=10000.0):
    """Pure-JAX f32 replica of the PyTorch forward, for correctness checking."""
    B, Cin, H, W = feat_map.shape
    Cout = conv_w.shape[0]
    y = jnp.einsum('bchw,oc->bohw', feat_map, conv_w.reshape(Cout, Cin)) \
        + conv_b[None, :, None, None]
    yg = y.reshape(B, num_groups, Cout // num_groups, H, W)
    mean = yg.mean(axis=(2, 3, 4), keepdims=True)
    var = yg.var(axis=(2, 3, 4), keepdims=True)
    yn = (yg - mean) / jnp.sqrt(var + gn_eps)
    yn = yn.reshape(B, Cout, H, W) * gn_gamma[None, :, None, None] \
         + gn_beta[None, :, None, None]

    npf = Cout // 2
    scale = 2.0 * math.pi
    not_mask = jnp.ones((B, H, W), jnp.float32)
    y_embed = jnp.cumsum(not_mask, axis=1)
    x_embed = jnp.cumsum(not_mask, axis=2)
    y_embed = y_embed / (y_embed[:, -1:, :] + 1e-6) * scale
    x_embed = x_embed / (x_embed[:, :, -1:] + 1e-6) * scale
    dim_t = temperature ** (2.0 * (jnp.arange(npf) // 2).astype(jnp.float32) / npf)
    px = x_embed[..., None] / dim_t
    py = y_embed[..., None] / dim_t
    px = jnp.stack([jnp.sin(px[..., 0::2]), jnp.cos(px[..., 1::2])], axis=-1).reshape(B, H, W, npf)
    py = jnp.stack([jnp.sin(py[..., 0::2]), jnp.cos(py[..., 1::2])], axis=-1).reshape(B, H, W, npf)
    pos = jnp.concatenate([py, px], axis=-1).transpose(0, 3, 1, 2)    # (B, Cout, H, W)

    src_flat = yn.reshape(B, Cout, H * W).transpose(0, 2, 1)
    pos_flat = pos.reshape(B, Cout, H * W).transpose(0, 2, 1)
    return src_flat, pos_flat


if __name__ == "__main__":
    # Module defaults: in_dim=128, out_dim=128, GroupNorm(32, out_dim) => Cout % 32 == 0.
    # Cout = 128 also keeps the output last dim lane-dense (>= 128).
    B, Cin, H, W = 2, 128, 16, 16
    Cout = 128

    key = jax.random.PRNGKey(0)
    kx, kw, kb = jax.random.split(key, 3)
    feat_map = jax.random.normal(kx, (B, Cin, H, W), dtype=jnp.float32)

    # Conv2d(Cin, Cout, 1): xavier_uniform_(gain=1) weight.  The module inits the
    # bias to zero; we use a small non-zero bias here to exercise the analytic
    # bias-folding path (a trained module would have non-zero bias anyway).
    bound = math.sqrt(6.0 / (Cin + Cout))
    conv_w = jax.random.uniform(kw, (Cout, Cin, 1, 1), jnp.float32, -bound, bound)
    conv_b = 0.1 * jax.random.normal(kb, (Cout,), dtype=jnp.float32)
    gn_gamma = jnp.ones((Cout,), jnp.float32)
    gn_beta = jnp.zeros((Cout,), jnp.float32)

    # block_rows=64 -> 4 HW tiles, exercising the two-pass (tiled) GroupNorm path.
    src, pos = feat_map_lifter(feat_map, conv_w, conv_b, gn_gamma, gn_beta,
                               block_rows=64)
    src, pos = jax.block_until_ready((src, pos))

    src_ref, pos_ref = _reference(feat_map, conv_w, conv_b, gn_gamma, gn_beta)
    # src uses bf16 matmul operands with f32 accumulation -> relaxed tolerance.
    np.testing.assert_allclose(np.asarray(src), np.asarray(src_ref), rtol=2e-2, atol=2e-2)
    np.testing.assert_allclose(np.asarray(pos), np.asarray(pos_ref), rtol=1e-4, atol=1e-4)
    assert src.shape == (B, H * W, Cout) and pos.shape == (B, H * W, Cout)

    print("KERNEL_OK")
</pallas_src>

<mosaic_0001>
module attributes {stable_mosaic.version = 11 : i64} {
  func.func @_src_kernel(%arg0: i32, %arg1: i32, %arg2: i32, %arg3: memref<1x64x128xbf16, #tpu.memory_space<vmem>>, %arg4: memref<128x128xbf16, #tpu.memory_space<vmem>>, %arg5: memref<1x128xf32, #tpu.memory_space<vmem>>, %arg6: memref<1x128xf32, #tpu.memory_space<vmem>>, %arg7: memref<1x128xf32, #tpu.memory_space<vmem>>, %arg8: memref<1x128xf32, #tpu.memory_space<vmem>>, %arg9: memref<128x1xf32, #tpu.memory_space<vmem>>, %arg10: memref<1x64x128xf32, #tpu.memory_space<vmem>>, %arg11: memref<2x128xf32, #tpu.memory_space<vmem>>, %arg12: memref<1x128xf32, #tpu.memory_space<vmem>>, %arg13: memref<1x128xf32, #tpu.memory_space<vmem>>) attributes {dimension_semantics = [#tpu.dimension_semantics<parallel>, #tpu.dimension_semantics<arbitrary>, #tpu.dimension_semantics<arbitrary>], iteration_bounds = array<i64: 2, 2, 4>, scalar_prefetch = 0 : i64, scratch_operands = 3 : i64, tpu.core_type = #tpu.core_type<tc>, window_params = [{transform_indices = @transform_0, window_bounds = array<i64: 1, 64, 128>}, {pipeline_mode = #tpu.pipeline_mode<synchronous>, transform_indices = @transform_1, window_bounds = array<i64: 128, 128>}, {pipeline_mode = #tpu.pipeline_mode<synchronous>, transform_indices = @transform_2, window_bounds = array<i64: 1, 128>}, {pipeline_mode = #tpu.pipeline_mode<synchronous>, transform_indices = @transform_3, window_bounds = array<i64: 1, 128>}, {pipeline_mode = #tpu.pipeline_mode<synchronous>, transform_indices = @transform_4, window_bounds = array<i64: 1, 128>}, {pipeline_mode = #tpu.pipeline_mode<synchronous>, transform_indices = @transform_5, window_bounds = array<i64: 1, 128>}, {pipeline_mode = #tpu.pipeline_mode<synchronous>, transform_indices = @transform_6, window_bounds = array<i64: 128, 1>}, {transform_indices = @transform_7, window_bounds = array<i64: 1, 64, 128>}]} {
    %c0 = arith.constant 0 : index
    %c0_0 = arith.constant 0 : index
    %c0_1 = arith.constant 0 : index
    %0 = vector.load %arg3[%c0, %c0_0, %c0_1] : memref<1x64x128xbf16, #tpu.memory_space<vmem>>, vector<1x64x128xbf16>
    %1 = vector.shape_cast %0 : vector<1x64x128xbf16> to vector<64x128xbf16>
    %c0_2 = arith.constant 0 : index
    %c0_3 = arith.constant 0 : index
    %2 = vector.load %arg4[%c0_2, %c0_3] : memref<128x128xbf16, #tpu.memory_space<vmem>>, vector<128x128xbf16>
    %cst = arith.constant dense<0.000000e+00> : vector<64x128xf32>
    %3 = tpu.matmul %1, %2, %cst {dimension_numbers = #tpu.dot_dimension_numbers<[1], [0], [0], [1], [0, 0, 1, 1], [], []>} : vector<64x128xbf16>, vector<128x128xbf16>, vector<64x128xf32> -> vector<64x128xf32>
    %c0_i32 = arith.constant 0 : i32
    %4 = arith.cmpi eq, %arg1, %c0_i32 : i32
    %5 = arith.extui %4 : i1 to i32
    %c0_i32_4 = arith.constant 0 : i32
    %6 = arith.cmpi ne, %5, %c0_i32_4 : i32
    scf.if %6 {
      %c0_i32_6 = arith.constant 0 : i32
      %10 = arith.cmpi eq, %arg2, %c0_i32_6 : i32
      %11 = arith.extui %10 : i1 to i32
      %c0_i32_7 = arith.constant 0 : i32
      %12 = arith.cmpi ne, %11, %c0_i32_7 : i32
      scf.if %12 {
        %cst_15 = arith.constant 0.000000e+00 : f32
        %25 = vector.broadcast %cst_15 : f32 to vector<2x128xf32>
        %c0_16 = arith.constant 0 : index
        %c0_17 = arith.constant 0 : index
        %26 = vector.load %arg11[%c0_16, %c0_17] : memref<2x128xf32, #tpu.memory_space<vmem>>, vector<2x128xf32>
        tpu.vector_store %arg11[%c0_16, %c0_17], %25 {strides = array<i32>} : memref<2x128xf32, #tpu.memory_space<vmem>>, vector<2x128xf32>,
      } else {
      }
      %cst_8 = arith.constant dense<0.000000e+00> : vector<128xf32>
      %13 = vector.multi_reduction <add>, %3, %cst_8 [0] : vector<64x128xf32> to vector<128xf32>
      %14 = vector.shape_cast %13 : vector<128xf32> to vector<1x128xf32>
      %15 = arith.mulf %3, %3 : vector<64x128xf32>
      %cst_9 = arith.constant dense<0.000000e+00> : vector<128xf32>
      %16 = vector.multi_reduction <add>, %15, %cst_9 [0] : vector<64x128xf32> to vector<128xf32>
      %17 = vector.shape_cast %16 : vector<128xf32> to vector<1x128xf32>
      %c0_10 = arith.constant 0 : index
      %c0_11 = arith.constant 0 : index
      %18 = vector.load %arg11[%c0_10, %c0_11] : memref<2x128xf32, #tpu.memory_space<vmem>>, vector<2x128xf32>
      %19 = tpu.concatenate %14, %17 in 0 : vector<1x128xf32>, vector<1x128xf32> -> vector<2x128xf32>
      %20 = arith.addf %18, %19 : vector<2x128xf32>
      %c0_12 = arith.constant 0 : index
      %c0_13 = arith.constant 0 : index
      %21 = vector.load %arg11[%c0_12, %c0_13] : memref<2x128xf32, #tpu.memory_space<vmem>>, vector<2x128xf32>
      tpu.vector_store %arg11[%c0_12, %c0_13], %20 {strides = array<i32>} : memref<2x128xf32, #tpu.memory_space<vmem>>, vector<2x128xf32>,
      %c3_i32 = arith.constant 3 : i32
      %22 = arith.cmpi eq, %arg2, %c3_i32 : i32
      %23 = arith.extui %22 : i1 to i32
      %c0_i32_14 = arith.constant 0 : i32
      %24 = arith.cmpi ne, %23, %c0_i32_14 : i32
      scf.if %24 {
        %c0_15 = arith.constant 0 : index
        %c0_16 = arith.constant 0 : index
        %25 = vector.load %arg5[%c0_15, %c0_16] : memref<1x128xf32, #tpu.memory_space<vmem>>, vector<1x128xf32>
        %c0_17 = arith.constant 0 : index
        %c0_18 = arith.constant 0 : index
        %26 = vector.load %arg11[%c0_17, %c0_18] : memref<2x128xf32, #tpu.memory_space<vmem>>, vector<1x128xf32>
        %c1 = arith.constant 1 : index
        %c0_19 = arith.constant 0 : index
        %27 = vector.load %arg11[%c1, %c0_19] : memref<2x128xf32, #tpu.memory_space<vmem>>, vector<1x128xf32>
        %cst_20 = arith.constant 2.560000e+02 : f32
        %28 = vector.broadcast %cst_20 : f32 to vector<1x128xf32>
        %29 = arith.mulf %28, %25 : vector<1x128xf32>
        %30 = arith.addf %26, %29 : vector<1x128xf32>
        %cst_21 = arith.constant 2.000000e+00 : f32
        %31 = vector.broadcast %cst_21 : f32 to vector<1x128xf32>
        %32 = arith.mulf %31, %25 : vector<1x128xf32>
        %33 = arith.mulf %32, %26 : vector<1x128xf32>
        %34 = arith.addf %27, %33 : vector<1x128xf32>
        %35 = arith.mulf %25, %25 : vector<1x128xf32>
        %cst_22 = arith.constant 2.560000e+02 : f32
        %36 = vector.broadcast %cst_22 : f32 to vector<1x128xf32>
        %37 = arith.mulf %36, %35 : vector<1x128xf32>
        %38 = arith.addf %34, %37 : vector<1x128xf32>
        %c0_23 = arith.constant 0 : index
        %c0_24 = arith.constant 0 : index
        %39 = vector.load %arg9[%c0_23, %c0_24] : memref<128x1xf32, #tpu.memory_space<vmem>>, vector<128x1xf32>
        %c0_25 = arith.constant 0 : index
        %c0_26 = arith.constant 0 : index
        %40 = vector.load %arg8[%c0_25, %c0_26] : memref<1x128xf32, #tpu.memory_space<vmem>>, vector<1x128xf32>
        %41 = vector.broadcast %39 : vector<128x1xf32> to vector<128x128xf32>
        %42 = vector.broadcast %40 : vector<1x128xf32> to vector<128x128xf32>
        %43 = arith.subf %41, %42 : vector<128x128xf32>
        %44 = math.absf %43 : vector<128x128xf32>
        %cst_27 = arith.constant 5.000000e-01 : f32
        %45 = vector.broadcast %cst_27 : f32 to vector<128x128xf32>
        %46 = arith.cmpf olt, %44, %45 : vector<128x128xf32>
        %47 = arith.extui %46 : vector<128x128xi1> to vector<128x128xi32>
        %48 = arith.sitofp %47 : vector<128x128xi32> to vector<128x128xf32>
        %49 = tpu.concatenate %30, %38 in 0 : vector<1x128xf32>, vector<1x128xf32> -> vector<2x128xf32>
        %cst_28 = arith.constant dense<0.000000e+00> : vector<2x128xf32>
        %50 = tpu.matmul %49, %48, %cst_28 {dimension_numbers = #tpu.dot_dimension_numbers<[1], [0], [0], [1], [0, 0, 1, 1], [], []>} : vector<2x128xf32>, vector<128x128xf32>, vector<2x128xf32> -> vector<2x128xf32>
        %cst_29 = arith.constant 9.765625E-4 : f32
        %51 = vector.broadcast %cst_29 : f32 to vector<2x128xf32>
        %52 = arith.mulf %50, %51 : vector<2x128xf32>
        %53 = vector.extract_strided_slice %52 {offsets = [0, 0], sizes = [1, 128], strides = [1, 1]} : vector<2x128xf32> to vector<1x128xf32>
        %54 = vector.extract_strided_slice %52 {offsets = [1, 0], sizes = [1, 128], strides = [1, 1]} : vector<2x128xf32> to vector<1x128xf32>
        %55 = arith.mulf %53, %53 : vector<1x128xf32>
        %56 = arith.subf %54, %55 : vector<1x128xf32>
        %cst_30 = arith.constant 0.000000e+00 : f32
        %57 = vector.broadcast %cst_30 : f32 to vector<1x128xf32>
        %58 = arith.maximumf %56, %57 : vector<1x128xf32>
        %cst_31 = arith.constant 9.99999974E-6 : f32
        %59 = vector.broadcast %cst_31 : f32 to vector<1x128xf32>
        %60 = arith.addf %58, %59 : vector<1x128xf32>
        %61 = math.rsqrt %60 : vector<1x128xf32>
        %c0_32 = arith.constant 0 : index
        %c0_33 = arith.constant 0 : index
        %62 = vector.load %arg6[%c0_32, %c0_33] : memref<1x128xf32, #tpu.memory_space<vmem>>, vector<1x128xf32>
        %63 = arith.mulf %61, %62 : vector<1x128xf32>
        %c0_34 = arith.constant 0 : index
        %c0_35 = arith.constant 0 : index
        %64 = vector.load %arg12[%c0_34, %c0_35] : memref<1x128xf32, #tpu.memory_space<vmem>>, vector<1x128xf32>
        tpu.vector_store %arg12[%c0_34, %c0_35], %63 {strides = array<i32>} : memref<1x128xf32, #tpu.memory_space<vmem>>, vector<1x128xf32>,
        %c0_36 = arith.constant 0 : index
        %c0_37 = arith.constant 0 : index
        %65 = vector.load %arg7[%c0_36, %c0_37] : memref<1x128xf32, #tpu.memory_space<vmem>>, vector<1x128xf32>
        %66 = arith.subf %25, %53 : vector<1x128xf32>
        %67 = arith.mulf %66, %63 : vector<1x128xf32>
        %68 = arith.addf %65, %67 : vector<1x128xf32>
        %c0_38 = arith.constant 0 : index
        %c0_39 = arith.constant 0 : index
        %69 = vector.load %arg13[%c0_38, %c0_39] : memref<1x128xf32, #tpu.memory_space<vmem>>, vector<1x128xf32>
        tpu.vector_store %arg13[%c0_38, %c0_39], %68 {strides = array<i32>} : memref<1x128xf32, #tpu.memory_space<vmem>>, vector<1x128xf32>,
      } else {
      }
    } else {
    }
    %c1_i32 = arith.constant 1 : i32
    %7 = arith.cmpi eq, %arg1, %c1_i32 : i32
    %8 = arith.extui %7 : i1 to i32
    %c0_i32_5 = arith.constant 0 : i32
    %9 = arith.cmpi ne, %8, %c0_i32_5 : i32
    scf.if %9 {
      %c0_6 = arith.constant 0 : index
      %c0_7 = arith.constant 0 : index
      %10 = vector.load %arg12[%c0_6, %c0_7] : memref<1x128xf32, #tpu.memory_space<vmem>>, vector<1x128xf32>
      %11 = vector.broadcast %10 : vector<1x128xf32> to vector<64x128xf32>
      %12 = arith.mulf %3, %11 : vector<64x128xf32>
      %c0_8 = arith.constant 0 : index
      %c0_9 = arith.constant 0 : index
      %13 = vector.load %arg13[%c0_8, %c0_9] : memref<1x128xf32, #tpu.memory_space<vmem>>, vector<1x128xf32>
      %14 = vector.broadcast %13 : vector<1x128xf32> to vector<64x128xf32>
      %15 = arith.addf %12, %14 : vector<64x128xf32>
      %c0_10 = arith.constant 0 : index
      %c0_11 = arith.constant 0 : index
      %c0_12 = arith.constant 0 : index
      %16 = vector.load %arg10[%c0_10, %c0_11, %c0_12] : memref<1x64x128xf32, #tpu.memory_space<vmem>>, vector<1x64x128xf32>
      %17 = vector.shape_cast %16 : vector<1x64x128xf32> to vector<64x128xf32>
      %18 = vector.shape_cast %15 : vector<64x128xf32> to vector<1x64x128xf32>
      tpu.vector_store %arg10[%c0_10, %c0_11, %c0_12], %18 {strides = array<i32>} : memref<1x64x128xf32, #tpu.memory_space<vmem>>, vector<1x64x128xf32>,
    } else {
    }
    return
  }
  func.func @transform_0(%arg0: i32, %arg1: i32, %arg2: i32) -> (i32, i32, i32) {
    %c0_i32 = arith.constant 0 : i32
    %c0_i32_0 = arith.constant 0 : i32
    return %arg0, %arg2, %c0_i32 : i32, i32, i32
  }
  func.func @transform_1(%arg0: i32, %arg1: i32, %arg2: i32) -> (i32, i32) {
    %c0_i32 = arith.constant 0 : i32
    %c0_i32_0 = arith.constant 0 : i32
    %c0_i32_1 = arith.constant 0 : i32
    return %c0_i32, %c0_i32_0 : i32, i32
  }
  func.func @transform_2(%arg0: i32, %arg1: i32, %arg2: i32) -> (i32, i32) {
    %c0_i32 = arith.constant 0 : i32
    %c0_i32_0 = arith.constant 0 : i32
    %c0_i32_1 = arith.constant 0 : i32
    return %c0_i32, %c0_i32_0 : i32, i32
  }
  func.func @transform_3(%arg0: i32, %arg1: i32, %arg2: i32) -> (i32, i32) {
    %c0_i32 = arith.constant 0 : i32
    %c0_i32_0 = arith.constant 0 : i32
    %c0_i32_1 = arith.constant 0 : i32
    return %c0_i32, %c0_i32_0 : i32, i32
  }
  func.func @transform_4(%arg0: i32, %arg1: i32, %arg2: i32) -> (i32, i32) {
    %c0_i32 = arith.constant 0 : i32
    %c0_i32_0 = arith.constant 0 : i32
    %c0_i32_1 = arith.constant 0 : i32
    return %c0_i32, %c0_i32_0 : i32, i32
  }
  func.func @transform_5(%arg0: i32, %arg1: i32, %arg2: i32) -> (i32, i32) {
    %c0_i32 = arith.constant 0 : i32
    %c0_i32_0 = arith.constant 0 : i32
    %c0_i32_1 = arith.constant 0 : i32
    return %c0_i32, %c0_i32_0 : i32, i32
  }
  func.func @transform_6(%arg0: i32, %arg1: i32, %arg2: i32) -> (i32, i32) {
    %c0_i32 = arith.constant 0 : i32
    %c0_i32_0 = arith.constant 0 : i32
    %c0_i32_1 = arith.constant 0 : i32
    return %c0_i32, %c0_i32_0 : i32, i32
  }
  func.func @transform_7(%arg0: i32, %arg1: i32, %arg2: i32) -> (i32, i32, i32) {
    %0 = arith.muli %arg1, %arg2 : i32
    %c0_i32 = arith.constant 0 : i32
    %c0_i32_0 = arith.constant 0 : i32
    return %arg0, %0, %c0_i32 : i32, i32, i32
  }
}

</mosaic_0001>

<bundles_post_ra>
// kernel: tpu_custom_call.1
= control target key start
LH: loop header
LB: loop body
LE: loop exit
PB: predicated region body
PF: predicated region fallthrough
CT: control target
= control target key end

     0   :  { %s2028_s0 = inlined_call_operand.hbm [shape: bf16[2,256,128], index: 0, kind: input, shape index: {}]   ;;  %s2029_s1 = inlined_call_operand.vmem [shape: bf16[128,128], index: 1, kind: input, shape index: {}]   ;;  %s2030_s2 = inlined_call_operand.vmem [shape: f32[1,128], index: 2, kind: input, shape index: {}]   ;;  %s2031_s3 = inlined_call_operand.vmem [shape: f32[1,128], index: 3, kind: input, shape index: {}]   ;;  %s2032_s4 = inlined_call_operand.vmem [shape: f32[1,128], index: 4, kind: input, shape index: {}]   ;;  %s2033_s5 = inlined_call_operand.vmem [shape: f32[1,128], index: 5, kind: input, shape index: {}]   ;;  %s2034_s6 = inlined_call_operand.vmem [shape: f32[128,1], index: 6, kind: input, shape index: {}]   ;;  %s2035_s7 = inlined_call_operand.hbm [shape: f32[2,256,128], index: 7, kind: output, shape index: {}]  }
   0x1   :  { %2043 = sst [smem:[#allocation18_spill]] %s2028_s0 }
   0x2   :  { %2044 = sst [smem:[#allocation19_spill]] %s2031_s3 }
   0x3   :  { %2045 = sst [smem:[#allocation20_spill]] %s2032_s4 }
   0x4   :  { %2046 = sst [smem:[#allocation21_spill]] %s2035_s7 }
   0x5   :  { %12 = vsyncpa [#allocation6], 0 }
   0x6   :  { %14 = vsyncpa [#allocation6 + $0x1], 0 }
   0x7   :  { %15 = vsyncpa [#allocation7], 0 }
   0x8   :  { %17 = vsyncpa [#allocation7 + $0x1], 0  ;;  %s1569_s24 = smov 0   ;;  %s1571_s25 = smov 0  }
   0x9   :  { %s1573_s26 = smov 0   ;;  %s1575_s27 = smov 0  }
   0xa   :  { %s1577_s28 = smov 0   ;;  %s1579_s29 = smov 0  }
   0xb   :  { %s1581_s30 = smov 0   ;;  %s1583_s8 = smov 0  }
   0xc   :  { %s1585_s9 = smov 0   ;;  %s1587_s10 = smov 0  }
   0xd   :  { %s1589_s11 = smov 0   ;;  %s1591_s12 = smov 0  }
   0xe   :  { %s1593_s13 = smov 0  }
   0xf LB: > { %2047 = sst [smem:[#allocation11_spill]] %s1486_s29  ;;  %s1004_s14 = sadd.s32 4294967295, %s1514_s13   ;;  %s1514_s13 = sphi %s1593_s13, %s23_s13   ;;  %s1510_s12 = sphi %s1591_s12, %s2084_s12   ;;  %s1506_s11 = sphi %s1589_s11, %s2073_s11   ;;  %s1502_s10 = sphi %s1587_s10, %s2083_s10   ;;  %s1498_s9 = sphi %s1585_s9, %s2082_s9   ;;  %s1494_s8 = sphi %s1583_s8, %s2071_s8   ;;  %s1490_s30 = sphi %s1581_s30, %s2081_s30   ;;  %s1486_s29 = sphi %s1579_s29, %s2070_s29   ;;  %s1482_s28 = sphi %s1577_s28, %s2080_s28   ;;  %s1478_s27 = sphi %s1575_s27, %s2079_s27   ;;  %s1474_s26 = sphi %s1573_s26, %s2078_s26   ;;  %s1470_s25 = sphi %s1571_s25, %s2077_s25   ;;  %s1466_s24 = sphi %s1569_s24, %s2076_s24  }
  0x10   : > { %2048 = sst [smem:[#allocation12_spill]] %s1498_s9  ;;  %s35_s16 = sadd.s32 1, %s1502_s10 }
  0x11   : > { %2049 = sst [smem:[#allocation13_spill]] %s1506_s11  ;;  %s38_s17 = sadd.s32 1, %s1506_s11 }
  0x12   : > { %p36_p0 = scmp.ge.s32.totalorder %s35_s16, 4  ;;  %s42_s18 = sadd.s32 1, %s1510_s12 }
  0x13   : > { %p58_p1 = scmp.ne.s32.totalorder %s1486_s29, %s1482_s28  ;;  %p59_p2 = scmp.eq.s32.totalorder %s1514_s13, 0 }
  0x14   : > { %s2086_s16 = smov (%p36_p0, %s35_s16), 0  ;;  %s2088_s17 = smov (!%p36_p0, %s38_s17), %s1506_s11 }
  0x15   : > { %2050 = sst [smem:[#allocation14_spill]] %s2086_s16  ;;  %s47_s20 = ssub.s32 %s1502_s10, %s2086_s16 }
  0x16   : > { %p40_p3 = scmp.ge.s32.totalorder %s2088_s17, 2  ;;  %p64_p4 = scmp.ne.s32.totalorder %s1482_s28, %s1478_s27 }
  0x17   : > { %p1647_p5 = por %p59_p2, %p58_p1  ;;  %p65_p6 = scmp.eq.s32.totalorder %s1004_s14, 0 }
  0x18   : > { %s2090_s17 = smov (%p40_p3, %s2088_s17), 0  ;;  %s2092_s18 = smov (!%p40_p3, %s42_s18), %s1510_s12 }
  0x19   : > { %2052 = sst [smem:[#allocation15_spill]] %s2090_s17  ;;  %p1654_p7 = por %p65_p6, %p64_p4 }
  0x1a   : > { %s200_s23 = smul.u32 %s1502_s10, %s1506_s11  ;;  %p44_p8 = scmp.ge.s32.totalorder %s2092_s18, 2 }
  0x1b   : > { %s201_s27 = smul.u32 %s2090_s17, %s2086_s16  ;;  %s207_s19 = sadd.s32 1, %s1474_s26 }
  0x1c   : > { %p217_p9 = scmp.ne.s32.totalorder %s1474_s26, %s1470_s25  ;;  %s2094_s18 = smov (%p44_p8, %s2092_s18), 0 }
  0x1d   : > { %2054 = sst [smem:[#allocation16_spill]] %s2094_s18  ;;  %s203_s15 = ssub.s32 %s200_s23, %s201_s27 }
  0x1e   : > { %p218_p10 = scmp.eq.s32.totalorder %s1004_s14, 15  ;;  %s46_s7 = ssub.s32 %s1510_s12, %s2094_s18 }
  0x1f   : > { %p223_p11 = scmp.ne.s32.totalorder %s1470_s25, %s1466_s24  ;;  %s48_s9 = sor.u32 %s47_s20, %s46_s7 }
  0x20   : > { %s204_s11 = sor.u32 %s203_s15, %s46_s7  ;;  %p49_p12 = scmp.eq.s32.totalorder %s48_s9, 0 }
  0x21   : > { %p205_p13 = scmp.eq.s32.totalorder %s204_s11, 0  ;;  %p1671_p0 = por %p218_p10, %p217_p9 }
  0x22   : > { %s2056_s16 = sadd.s32 4294967294, %s1514_s13   ;;  %s2057_s4 = sadd.s32 1, %s1486_s29 }
  0x23   : > { %s2055_s17 = scalar_select %p1671_p0, 1, 0 }
  0x24   : > { %p224_p1 = scmp.eq.s32.totalorder %s2056_s16, 15  ;;  %p1213_p3 = scmp.lt.s32.totalorder %s1514_s13, 16 }
  0x25   : > { %s1680_s3 = scalar_select %p49_p12, %s1486_s29, %s2057_s4  }
  0x26   : > { %s1683_s23 = scalar_select %p205_p13, %s1474_s26, %s207_s19  }
  0x27   : > { %2058 = sst [smem:[#allocation17_spill]] %s1680_s3  ;;  %p1685_p2 = por %p224_p1, %p223_p11 }
  0x28   : > { %s262_s7 = sand.u32 1, %s1486_s29   ;;  %s1009_s11 = sshll.u32 %s1502_s10, 3 }
  0x29   : > { %s2059_s14 = scalar_select %p1685_p2, 1, 0 }
  0x2a   : > { %s1008_s9 = sshll.u32 %s262_s7, 5  ;;  %s1010_s15 = sshll.u32 %s1510_s12, 5 }
  0x2b   : > { %s266_s20 = scalar_lea.vmem [#allocation5], %s1008_s9  ;;  %s272_s18 = sadd.s32 %s1010_s15, %s1009_s11 }
  0x2c   : > { %s275_s27 = sshll.u32 %s266_s20, 4  ;;  %s1011_s16 = sshll.u32 %s272_s18, 6  ;;  %s1693_s27 = int_to_ptr.vmem [resolvable:$true] %s275_s27 }
  0x2d   : > { %p1697_p4 = pnand %p1213_p3, %p1647_p5  ;;  %s2061_s0 = sld [smem:[#allocation18_spill]] }
  0x2e   : > { %s1706_s9 = scalar_lea.sflag [#allocation6], %s262_s7 }
  0x2f   : > { %p1348_p5 = pneg %p1697_p4 }
  0x33   : > { %s1704_s29 = scalar_lea.hbm %s2061_s0, %s1011_s16  ;;  %s1351_s21 = scalar_lea.hbm %s2061_s0, 4096 }
  0x34   : > { %s1346_s11 = scalar_lea.hbm %s1704_s29, 512  ;;  %p1352_p10 = scmp.lt.u32.totalorder %s1704_s29, %s2061_s0 }
  0x35   : > { %p1347_p6 = scmp.ne.s32.totalorder %s1704_s29, %s1346_s11  ;;  %p1353_p11 = scmp.lt.u32.totalorder %s1351_s21, %s1346_s11 }
  0x36   : > { %p1355_p13 = scmp.lt.u32.totalorder %s1346_s11, %s1704_s29 }
  0x37   : > { %p1349_p8 = pnand %p1348_p5, %p1347_p6  ;;  %p1354_p12 = por %p1353_p11, %p1352_p10 }
  0x39   : > { %p1350_p9 = pneg %p1349_p8  ;;  %p1356_p1 = por %p1355_p13, %p1354_p12 }
  0x3b   : > { %p1357_p3 = pnand %p1356_p1, %p1350_p9 }
  0x3d   : > { %1360 = shalt.err (!%p1357_p3)
}
  0x3e   : > { %s1361_s7 = scalar_lea.vmem %s1693_s27, 512  ;;  %s1516_s16 = smov [#allocation5]  }
  0x3f   : > { %p1362_p6 = scmp.ne.s32.totalorder %s1693_s27, %s1361_s7  ;;  %s1366_s19 = sshll.u32 %s1516_s16, 4  ;;  %s1367_s19 = int_to_ptr.vmem [resolvable:$false] %s1366_s19 }
  0x40   : > { %s1368_s18 = scalar_lea.vmem %s1367_s19, 1024  ;;  %p1369_p0 = scmp.lt.s32.totalorder %s1693_s27, %s1367_s19 }
  0x41   : > { %p1364_p8 = pnand %p1362_p6, %p1348_p5  ;;  %p1370_p10 = scmp.lt.s32.totalorder %s1368_s18, %s1361_s7 }
  0x43   : > { %p1365_p2 = pneg %p1364_p8  ;;  %p1371_p11 = por %p1370_p10, %p1369_p0 }
  0x45   : > { %p1372_p12 = pnand %p1371_p11, %p1365_p2 }
  0x47   : > { %1375 = shalt.err (!%p1372_p12)
}
  0x48   : > { %s1517_s11 = smov 64   ;;  %s1518_s3 = smov 4  }
  0x49   : > { %1208 = dma.hbm_to_vmem [thread:$0]  (!%p1697_p4), %s1704_s29, 512, %s1693_s27, %s1706_s9, %s1517_s11, %s1517_s11, %s1518_s3  }
  0x4a   : > { %p1012_p5 = scmp.ge.s32.totalorder %s1514_s13, 1  ;;  %p283_p9 = scmp.lt.s32.totalorder %s1514_s13, 17 }
  0x4c   : > { %p284_p13 = pnand %p1012_p5, %p283_p9 }
  0x4d   : > { %s289_s21 = sand.u32 (!%p284_p13), 1, %s1482_s28  }
  0x4e   : > { %287 = sbr.rel (%p284_p13) target bundleno = 806 (0x326), region = 48  ;;  %s1013_s15 = sshll.u32 (!%p284_p13), %s289_s21, 5 }
  0x4f   : > { %s290_s20 = scalar_lea.sflag (!%p284_p13), [#allocation6], %s289_s21  ;;  %s1737_s7 = scalar_lea.vmem (!%p284_p13), [#allocation5], %s1013_s15 }
  0x55   : > { %1457 = dma.done.wait (%p1654_p7), %s290_s20, 512  }
  0x56   : > { %1459 = vsyncadd (%p1654_p7), %s290_s20, 4294966784  ;;  %s321_s4 = sand.u32 1, %s1470_s25   ;;  %v1330_v0 = vld [vmem:[%s2029_s1] sm:$0xff]   ;;  %v1331_v1 = vld [vmem:[%s2029_s1 + $0x8] sm:$0xff]   ;;  %p1027_p7 = scmp.ne.s32.totalorder %s1494_s8, 0 }
  0x57   : > { %s1746_s29 = sshll.u32 %s321_s4, 6  ;;  %1102 = vmatprep.subr.bf16.mxu0 %v1330_v0  ;;  %1185 = vmatprep.subr.bf16.mxu1 %v1330_v0  ;;  %v1332_v2 = vld [vmem:[%s2029_s1 + $0x10] sm:$0xff]   ;;  %v1333_v3 = vld [vmem:[%s2029_s1 + $0x18] sm:$0xff]   ;;  %v1338_v4 = vld [vmem:[%s1737_s7] sm:$0xff]   ;;  %p1028_p0 = scmp.ne.s32.totalorder (!%p1027_p7), %s1490_s30, 0 }
  0x58   : > { %1103 = vmatpush3.bf16.msra.mxu0 %v1330_v0  ;;  %1193 = vmatpush3.bf16.msra.mxu1 %v1330_v0  ;;  %v1339_v5 = vld [vmem:[%s1737_s7 + $0x10] sm:$0xff]   ;;  %v1334_v6 = vld [vmem:[%s2029_s1 + $0x20] sm:$0xff]   ;;  %v1335_v7 = vld [vmem:[%s2029_s1 + $0x28] sm:$0xff]  }
  0x59   : > { %1104 = vmatprep.subr.bf16.mxu0 %v1331_v1  ;;  %1186 = vmatprep.subr.bf16.mxu1 %v1331_v1  ;;  %v1336_v8 = vld [vmem:[%s2029_s1 + $0x30] sm:$0xff]   ;;  %v1337_v9 = vld [vmem:[%s2029_s1 + $0x38] sm:$0xff]  }
  0x5a   : > { %1118 = vmatprep.mubr.bf16.mxu0 %v1338_v4  ;;  %1122 = vmatprep.mubr.bf16.mxu1 %v1339_v5  ;;  %v1340_v10 = vld [vmem:[%s1737_s7 + $0x8] sm:$0xff]   ;;  %v1341_v11 = vld [vmem:[%s1737_s7 + $0x18] sm:$0xff]   ;;  %s1793_s7 = scalar_lea.vmem [#allocation8], %s1746_s29 }
  0x5c   : > { %1105 = vmatpush3.bf16.msra.mxu0 %v1331_v1  ;;  %1194 = vmatpush3.bf16.msra.mxu1 %v1331_v1 }
  0x5d   : > { %1106 = vmatprep.subr.bf16.mxu0 %v1332_v2  ;;  %1187 = vmatprep.subr.bf16.mxu1 %v1332_v2 }
  0x60   : > { %1107 = vmatpush3.bf16.msra.mxu0 %v1332_v2  ;;  %1195 = vmatpush3.bf16.msra.mxu1 %v1332_v2 }
  0x61   : > { %1108 = vmatprep.subr.bf16.mxu0 %v1333_v3  ;;  %1188 = vmatprep.subr.bf16.mxu1 %v1333_v3 }
  0x64   : > { %1109 = vmatpush3.bf16.msra.mxu0 %v1333_v3  ;;  %1196 = vmatpush3.bf16.msra.mxu1 %v1333_v3 }
  0x65   : > { %1110 = vmatprep.subr.bf16.mxu0 %v1334_v6  ;;  %1189 = vmatprep.subr.bf16.mxu1 %v1334_v6 }
  0x68   : > { %1111 = vmatpush3.bf16.msra.mxu0 %v1334_v6  ;;  %1197 = vmatpush3.bf16.msra.mxu1 %v1334_v6 }
  0x69   : > { %1112 = vmatprep.subr.bf16.mxu0 %v1335_v7  ;;  %1190 = vmatprep.subr.bf16.mxu1 %v1335_v7 }
  0x6c   : > { %1113 = vmatpush3.bf16.msra.mxu0 %v1335_v7  ;;  %1198 = vmatpush3.bf16.msra.mxu1 %v1335_v7 }
  0x6d   : > { %1114 = vmatprep.subr.bf16.mxu0 %v1336_v8  ;;  %1191 = vmatprep.subr.bf16.mxu1 %v1336_v8 }
  0x70   : > { %1115 = vmatpush3.bf16.msra.mxu0 %v1336_v8  ;;  %1199 = vmatpush3.bf16.msra.mxu1 %v1336_v8 }
  0x71   : > { %1116 = vmatprep.subr.bf16.mxu0 %v1337_v9  ;;  %1192 = vmatprep.subr.bf16.mxu1 %v1337_v9 }
  0x74   : > { %1117 = vmatpush3.bf16.msra.mxu0 %v1337_v9  ;;  %1200 = vmatpush3.bf16.msra.mxu1 %v1337_v9 }
  0x77   : > { %1119 = vmatmul.mubr.bf16.vlgmr.msra.gmra.mrb[0].mxu0 %v1340_v10  ;;  %1123 = vmatmul.mubr.bf16.vlgmr.msra.gmra.mrb[0].mxu1 %v1341_v11 }
 0x147   : > { %492 = sbr.rel (%p1027_p7) target bundleno = 763 (0x2fb), region = 56 }
 0x14a   : > { %v1776_v12 = vpop.f32.mrb[0].mxu0  ;;  %v1778_v13 = vpop.f32.mrb[0].mxu1 }
 0x14b   : > { %v1780_v14 = vpop.f32.mrb[1].mxu0  ;;  %v1782_v15 = vpop.f32.mrb[1].mxu1 }
 0x14c   : > { %v1784_v16 = vpop.f32.mrb[2].mxu0  ;;  %v1786_v17 = vpop.f32.mrb[2].mxu1 }
 0x14d   : > { %v1788_v18 = vpop.f32.mrb[3].mxu0  ;;  %v1790_v19 = vpop.f32.mrb[3].mxu1 }
 0x14e   : > { %496 = sbr.rel (%p1028_p0) target bundleno = 341 (0x155), region = 60  ;;  %v1519_v20 = vmov (!%p1028_p0), 0.0  }
 0x14f   : > { %497 = vst [vmem:[#allocation2] sm:$0x3] (!%p1028_p0), %v1519_v20 }
 0x155 PF: > { %v498_v21 = vadd.f32 %v1788_v18, %v1780_v14  ;;  %v511_v22 = vmul.f32 %v1780_v14, %v1780_v14  ;;  %v512_v23 = vmul.f32 %v1788_v18, %v1788_v18  ;;  %v513_v24 = vmul.f32 %v1776_v12, %v1776_v12  ;;  %p1029_p2 = scmp.ne.s32.totalorder %s1490_s30, 3 }
 0x156   : > { %v514_v26 = vmul.f32 %v1784_v16, %v1784_v16  ;;  %v515_v29 = vmul.f32 %v1782_v15, %v1782_v15  ;;  %v516_v32 = vmul.f32 %v1790_v19, %v1790_v19  ;;  %v517_v35 = vmul.f32 %v1778_v13, %v1778_v13  ;;  %v532_v55 = vld [vmem:[#allocation2] sm:$0x3]  ;;  %v554_v58 = vld [vmem:[%s2034_s6 + $0x10] sm:$0xff] (!%p1029_p2)  ;;  %v555_v61 = vld [vmem:[%s2034_s6 + $0x18] sm:$0xff] (!%p1029_p2)  ;;  %s2062_s11 = sld [smem:[#allocation19_spill]] (!%p1029_p2)  ;;  %s2063_s15 = sld [smem:[#allocation20_spill]] (!%p1029_p2) }
 0x157   : > { %v499_v25 = vadd.f32 %v1776_v12, %v498_v21  ;;  %v519_v27 = vadd.f32 %v512_v23, %v511_v22  ;;  %v518_v38 = vmul.f32 %v1786_v17, %v1786_v17  ;;  %vm533_vm0 = vcmask 1040384   ;;  %v552_v59 = vld [vmem:[%s2034_s6] sm:$0xff] (!%p1029_p2)  ;;  %v553_v62 = vld [vmem:[%s2034_s6 + $0x8] sm:$0xff] (!%p1029_p2)  ;;  %v559_v1 = vld [vmem:[%s2034_s6 + $0x38] sm:$0xff] (!%p1029_p2) }
 0x158   : > { %v1520_v60 = vmov (!%p1029_p2), 0   ;;  %v557_v63 = vld [vmem:[%s2034_s6 + $0x28] sm:$0xff] (!%p1029_p2)  ;;  %v556_v0 = vld [vmem:[%s2034_s6 + $0x20] sm:$0xff] (!%p1029_p2)  ;;  %v558_v2 = vld [vmem:[%s2034_s6 + $0x30] sm:$0xff] (!%p1029_p2)  ;;  %v1521_v3 = vmov (!%p1029_p2), 0.0|0.0   ;;  %vm1522_vm1 = vmmov (!%p1029_p2), 0  }
 0x159   : > { %v500_v28 = vadd.f32 %v1784_v16, %v499_v25  ;;  %v520_v30 = vadd.f32 %v519_v27, %v513_v24  ;;  %1343 = vset.pattern.permute.xlu1 (!%p1029_p2), %v1520_v60  ;;  %1342 = vset.pattern.permute.xlu0 (!%p1029_p2), %v1520_v60  ;;  %v561_v4 = vld [vmem:[%s2034_s6 + $0x48] sm:$0xff] (!%p1029_p2)  ;;  %v560_v5 = vld [vmem:[%s2034_s6 + $0x40] sm:$0xff] (!%p1029_p2)  ;;  %v563_v6 = vld [vmem:[%s2034_s6 + $0x58] sm:$0xff] (!%p1029_p2)  ;;  %v1523_v20 = vmov (!%p1029_p2), 0.0  }
 0x15a   : > { %581 = vperm.xlu1 (!%p1029_p2), %1343, %v554_v58   ;;  %571 = vperm.xlu0 (!%p1029_p2), %1342, %v552_v59   ;;  %v562_v7 = vld [vmem:[%s2034_s6 + $0x50] sm:$0xff] (!%p1029_p2)  ;;  %v565_v8 = vld [vmem:[%s2034_s6 + $0x68] sm:$0xff] (!%p1029_p2)  ;;  %v564_v9 = vld [vmem:[%s2034_s6 + $0x60] sm:$0xff] (!%p1029_p2) }
 0x15b   : > { %v501_v31 = vadd.f32 %v500_v28, %v1782_v15  ;;  %v521_v33 = vadd.f32 %v520_v30, %v514_v26  ;;  %1161 = vmatprep.subr.bf16.mxu0 (!%p1029_p2), %v1521_v3  ;;  %v567_v10 = vld [vmem:[%s2034_s6 + $0x78] sm:$0xff] (!%p1029_p2)  ;;  %v566_v11 = vld [vmem:[%s2034_s6 + $0x70] sm:$0xff] (!%p1029_p2)  ;;  %1158 = vmatprep.mubr.msk.f32.mxu0 (!%p1029_p2), %vm1522_vm1, %v1523_v20  ;;  %v1875_v21 = vld [vmem:[%s2033_s5] ss:$0 sm:$0xff] (!%p1029_p2) }
 0x15d   : > { %v502_v34 = vadd.f32 %v501_v31, %v1790_v19  ;;  %v522_v36 = vadd.f32 %v521_v33, %v515_v29 }
 0x15e   : > { %586 = vperm.xlu1 (!%p1029_p2), %1343, %v555_v61   ;;  %576 = vperm.xlu0 (!%p1029_p2), %1342, %v553_v62  }
 0x15f   : > { %v503_v37 = vadd.f32 %v1778_v13, %v502_v34  ;;  %v523_v39 = vadd.f32 %v522_v36, %v516_v32 }
 0x161   : > { %v504_v40 = vadd.f32 %v1786_v17, %v503_v37  ;;  %v524_v41 = vadd.f32 %v523_v39, %v517_v35 }
 0x162   : > { %596 = vperm.xlu1 (!%p1029_p2), %1343, %v557_v63   ;;  %591 = vperm.xlu0 (!%p1029_p2), %1342, %v556_v0  }
 0x163   : > { %v505_v42 = vrot.slane %v504_v40, 4  ;;  %v525_v43 = vadd.f32 %v524_v41, %v518_v38 }
 0x165   : > { %v506_v44 = vadd.f32 %v505_v42, %v504_v40  ;;  %v526_v45 = vrot.slane %v525_v43, 4  ;;  %v1524_v40 = vmov (!%p1029_p2), 1.0|1.0  }
 0x166   : > { %606 = vperm.xlu1 (!%p1029_p2), %1343, %v559_v1   ;;  %601 = vperm.xlu0 (!%p1029_p2), %1342, %v558_v2  }
 0x167   : > { %v507_v46 = vrot.slane %v506_v44, 2  ;;  %v527_v47 = vadd.f32 %v526_v45, %v525_v43  ;;  %v1890_v45 = vld [vmem:[%s2030_s2] sm:$0x1] (!%p1029_p2) }
 0x168   : > { %v549_v62 = vmul.f32 (!%p1029_p2), %v1890_v45, %v1890_v45 }
 0x169   : > { %v508_v48 = vadd.f32 %v507_v46, %v506_v44  ;;  %v528_v49 = vrot.slane %v527_v47, 2 }
 0x16a   : > { %616 = vperm.xlu1 (!%p1029_p2), %1343, %v561_v4   ;;  %611 = vperm.xlu0 (!%p1029_p2), %1342, %v560_v5  }
 0x16b   : > { %v509_v50 = vrot.slane %v508_v48, 1  ;;  %v529_v51 = vadd.f32 %v528_v49, %v527_v47 }
 0x16d   : > { %v510_v52 = vadd.f32 %v509_v50, %v508_v48  ;;  %v530_v53 = vrot.slane %v529_v51, 1 }
 0x16e   : > { %540 = sbr.rel (%p1029_p2) target bundleno = 763 (0x2fb), region = 64  ;;  %626 = vperm.xlu1 (!%p1029_p2), %1343, %v563_v6   ;;  %621 = vperm.xlu0 (!%p1029_p2), %1342, %v562_v7   ;;  %v550_v7 = vmul.f32 (!%p1029_p2), 256.0, %v549_v62 }
 0x16f   : > { %v531_v54 = vadd.f32 %v530_v53, %v529_v51  ;;  %v546_v53 = vmul.f32 (!%p1029_p2), 2.0, %v1890_v45 }
 0x171   : > { %v534_v56 = vsel %vm533_vm0, %v510_v52, %v531_v54 }
 0x172   : > { %v535_v57 = vadd.f32 %v534_v56, %v532_v55  ;;  %636 = vperm.xlu1 (!%p1029_p2), %1343, %v565_v8   ;;  %631 = vperm.xlu0 (!%p1029_p2), %1342, %v564_v9  }
 0x174   : > { %536 = vst [vmem:[#allocation2] sm:$0x3] %v535_v57 }
 0x176   : > { %646 = vperm.xlu1 %1343, %v567_v10   ;;  %641 = vperm.xlu0 %1342, %v566_v11  }
 0x17b   : > { %v542_v52 = vld [vmem:[#allocation2] sm:$0x1]  ;;  %v543_v60 = vld [vmem:[#allocation2 + $0x1] sm:$0x1] }
 0x17c   : > { %v547_v61 = vmul.f32 %v546_v53, %v542_v52 }
 0x17e   : > { %v548_v6 = vadd.f32 %v547_v61, %v543_v60 }
 0x1d9   : > { %v582_v22 = vpop.permute.xlu1 %581  ;;  %v572_v23 = vpop.permute.xlu0 %571 }
 0x1da   : > { %v655_v24 = vsub.f32 %v572_v23, %v1875_v21  ;;  %v657_v25 = vsub.f32 %v582_v22, %v1875_v21  ;;  %v544_v23 = vmul.f32 256.0, %v1890_v45 }
 0x1dc   : > { %v671_v30 = vand.u32 2147483647, %v655_v24  ;;  %v673_v32 = vand.u32 2147483647, %v657_v25  ;;  %v551_v24 = vadd.f32 %v550_v7, %v548_v6 }
 0x1dd   : > { %v587_v26 = vpop.permute.xlu1 %586  ;;  %v577_v27 = vpop.permute.xlu0 %576 }
 0x1de   : > { %v658_v28 = vsub.f32 %v587_v26, %v1875_v21  ;;  %v656_v29 = vsub.f32 %v577_v27, %v1875_v21  ;;  %vm687_vm3 = vcmp.lt.f32.partialorder %v671_v30, 0.5  ;;  %vm689_vm5 = vcmp.lt.f32.partialorder %v673_v32, 0.5 }
 0x1df   : > { %v736_v27 = vrot.slane %v551_v24, 7 }
 0x1e0   : > { %v672_v31 = vand.u32 2147483647, %v656_v29  ;;  %v674_v33 = vand.u32 2147483647, %v658_v28 }
 0x1e1   : > { %v597_v34 = vpop.permute.xlu1 %596  ;;  %v592_v35 = vpop.permute.xlu0 %591 }
 0x1e2   : > { %vm688_vm2 = vcmp.lt.f32.partialorder %v672_v31, 0.5  ;;  %v660_v36 = vsub.f32 %v597_v34, %v1875_v21  ;;  %v659_v37 = vsub.f32 %v592_v35, %v1875_v21  ;;  %vm690_vm6 = vcmp.lt.f32.partialorder %v674_v33, 0.5 }
 0x1e3   : > { %vm1162_vm4 = vmpackc.low %vm688_vm2, %vm687_vm3 }
 0x1e4   : > { %v676_v38 = vand.u32 2147483647, %v660_v36  ;;  %v675_v39 = vand.u32 2147483647, %v659_v37  ;;  %1163 = vmatpush3.bf16.msk.msra.mxu0 %vm1162_vm4, %v1524_v40  ;;  %vm1165_vm7 = vmpackc.low %vm690_vm6, %vm689_vm5  ;;  %v1525_v37 = vmov 1966171168  }
 0x1e5   : > { %v607_v41 = vpop.permute.xlu1 %606  ;;  %v602_v42 = vpop.permute.xlu0 %601  ;;  %1164 = vmatprep.subr.bf16.mxu0 %v1521_v3 }
 0x1e6   : > { %v662_v43 = vsub.f32 %v607_v41, %v1875_v21  ;;  %v661_v44 = vsub.f32 %v602_v42, %v1875_v21  ;;  %vm692_vm8 = vcmp.lt.f32.partialorder %v676_v38, 0.5  ;;  %vm691_vm9 = vcmp.lt.f32.partialorder %v675_v39, 0.5 }
 0x1e7   : > { %vm1168_vm10 = vmpackc.low %vm692_vm8, %vm691_vm9  ;;  %v831_v38 = vunpack.c.l.s4 %v1525_v37  ;;  %v833_v39 = vlaneseq }
 0x1e8   : > { %v678_v46 = vand.u32 2147483647, %v662_v43  ;;  %v677_v47 = vand.u32 2147483647, %v661_v44  ;;  %1166 = vmatpush3.bf16.msk.msra.mxu0 %vm1165_vm7, %v1524_v40 }
 0x1e9   : > { %v617_v48 = vpop.permute.xlu1 %616  ;;  %v612_v49 = vpop.permute.xlu0 %611  ;;  %1167 = vmatprep.subr.bf16.mxu0 %v1521_v3  ;;  %v832_v41 = vunpack.c.0.s8 %v831_v38 }
 0x1ea   : > { %v664_v50 = vsub.f32 %v617_v48, %v1875_v21  ;;  %v663_v51 = vsub.f32 %v612_v49, %v1875_v21  ;;  %vm694_vm11 = vcmp.lt.f32.partialorder %v678_v46, 0.5  ;;  %vm693_vm12 = vcmp.lt.f32.partialorder %v677_v47, 0.5 }
 0x1eb   : > { %vm1171_vm13 = vmpackc.low %vm694_vm11, %vm693_vm12 }
 0x1ec   : > { %v680_v54 = vand.u32 2147483647, %v664_v50  ;;  %v679_v55 = vand.u32 2147483647, %v663_v51  ;;  %1169 = vmatpush3.bf16.msk.msra.mxu0 %vm1168_vm10, %v1524_v40  ;;  %v827_v50 = vld [vmem:[%s2063_s15] sm:$0x1] }
 0x1ed   : > { %v627_v56 = vpop.permute.xlu1 %626  ;;  %v622_v57 = vpop.permute.xlu0 %621  ;;  %1170 = vmatprep.subr.bf16.mxu0 %v1521_v3 }
 0x1ee   : > { %v666_v58 = vsub.f32 %v627_v56, %v1875_v21  ;;  %v665_v59 = vsub.f32 %v622_v57, %v1875_v21  ;;  %vm696_vm14 = vcmp.lt.f32.partialorder %v680_v54, 0.5  ;;  %vm695_vm15 = vcmp.lt.f32.partialorder %v679_v55, 0.5 }
 0x1ef   : > { %vm1174_vm1 = vmpackc.low %vm696_vm14, %vm695_vm15 }
 0x1f0   : > { %v682_v63 = vand.u32 2147483647, %v666_v58  ;;  %v681_v0 = vand.u32 2147483647, %v665_v59  ;;  %1172 = vmatpush3.bf16.msk.msra.mxu0 %vm1171_vm13, %v1524_v40 }
 0x1f1   : > { %v637_v1 = vpop.permute.xlu1 %636  ;;  %v632_v2 = vpop.permute.xlu0 %631  ;;  %1173 = vmatprep.subr.bf16.mxu0 %v1521_v3 }
 0x1f2   : > { %v668_v4 = vsub.f32 %v637_v1, %v1875_v21  ;;  %v667_v5 = vsub.f32 %v632_v2, %v1875_v21  ;;  %vm698_vm2 = vcmp.lt.f32.partialorder %v682_v63, 0.5  ;;  %vm697_vm3 = vcmp.lt.f32.partialorder %v681_v0, 0.5 }
 0x1f3   : > { %vm1177_vm4 = vmpackc.low %vm698_vm2, %vm697_vm3 }
 0x1f4   : > { %v684_v8 = vand.u32 2147483647, %v668_v4  ;;  %v683_v9 = vand.u32 2147483647, %v667_v5  ;;  %1175 = vmatpush3.bf16.msk.msra.mxu0 %vm1174_vm1, %v1524_v40 }
 0x1f5   : > { %v647_v10 = vpop.permute.xlu1 %646  ;;  %v642_v11 = vpop.permute.xlu0 %641  ;;  %1176 = vmatprep.subr.bf16.mxu0 %v1521_v3 }
 0x1f6   : > { %v670_v20 = vsub.f32 %v647_v10, %v1875_v21  ;;  %v669_v22 = vsub.f32 %v642_v11, %v1875_v21  ;;  %vm700_vm5 = vcmp.lt.f32.partialorder %v684_v8, 0.5  ;;  %vm699_vm6 = vcmp.lt.f32.partialorder %v683_v9, 0.5 }
 0x1f7   : > { %vm1180_vm7 = vmpackc.low %vm700_vm5, %vm699_vm6  ;;  %v545_v21 = vadd.f32 %v544_v23, %v542_v52 }
 0x1f8   : > { %v686_v25 = vand.u32 2147483647, %v670_v20  ;;  %v685_v26 = vand.u32 2147483647, %v669_v22  ;;  %1178 = vmatpush3.bf16.msk.msra.mxu0 %vm1177_vm4, %v1524_v40 }
 0x1f9   : > { %1179 = vmatprep.subr.bf16.mxu0 %v1521_v3  ;;  %v738_v28 = vsel %vm533_vm0, %v545_v21, %v736_v27 }
 0x1fa   : > { %vm702_vm8 = vcmp.lt.f32.partialorder %v686_v25, 0.5  ;;  %vm701_vm9 = vcmp.lt.f32.partialorder %v685_v26, 0.5 }
 0x1fb   : > { %vm1183_vm10 = vmpackc.low %vm702_vm8, %vm701_vm9 }
 0x1fc   : > { %1181 = vmatpush3.bf16.msk.msra.mxu0 %vm1180_vm7, %v1524_v40 }
 0x1fd   : > { %1182 = vmatprep.subr.bf16.mxu0 %v1521_v3  ;;  %v834_v3 = vshrl.u32 %v833_v39, 7 }
 0x1ff   : > { %v835_v42 = vsub.s32 %v832_v41, %v834_v3 }
 0x200   : > { %1184 = vmatpush3.bf16.msk.msra.mxu0 %vm1183_vm10, %v1524_v40  ;;  %v1063_v40 = vld [vmem:[%s2062_s11] ss:$0 sm:$0xff] }
 0x203   : > { %1159 = vmatmul.mubr.f32.vlgmr.msra.gmra.mrb[0].mxu0 %v738_v28 }
 0x2d6   : > { %v805_v29 = vpop.f32.mrb[0].mxu0 }
 0x2d7   : > { %v809_v30 = vmul.f32 0.0009765625, %v805_v29  ;;  %v1160_v31 = vpop.f32.mrb[1].mxu0 }
 0x2d9   : > { %v810_v32 = vmul.f32 %v809_v30, %v809_v30  ;;  %v828_v48 = vsub.f32 %v1890_v45, %v809_v30 }
 0x2db   : > { %v812_v33 = vrot.slane %v810_v32, 7 }
 0x2dd   : > { %v814_v34 = vsub.f32 %v809_v30, %v812_v33 }
 0x2df   : > { %v815_v35 = vmax.f32 %v814_v34, 0.0 }
 0x2e1   : > { %v816_v36 = vadd.f32 1e-05, %v815_v35 }
 0x2e3   : > { %1344 = vrsqrt.f32 %v816_v36 }
 0x2ed   : > { %v1345_v43 = vpop.eup %1344 }
 0x2ee   : > { %v825_v44 = vmul.f32 %v1345_v43, %v1063_v40 }
 0x2f0   : > { %826 = vst [vmem:[#allocation3 - $0x1] sm:$0x2] %v825_v44  ;;  %v836_v46 = vrot.slane %v825_v44, %v835_v42 }
 0x2f2   : > { %v837_v47 = vcombine.high %v836_v46, %v836_v46 }
 0x2f4   : > { %v844_v49 = vrot.slane %v837_v47, %v835_v42 }
 0x2f6   : > { %v846_v51 = vmul.f32 %v844_v49, %v828_v48 }
 0x2f8   : > { %v847_v52 = vadd.f32 %v846_v51, %v827_v50 }
 0x2fa   : > { %848 = vst [vmem:[#allocation4] sm:$0x1] %v847_v52 }
 0x2fb PF: > { %p1064_p4 = scmp.ne.s32.totalorder %s1494_s8, 1 }
 0x2fc   : > { %v1065_v53 = vld [vmem:[#allocation3] ss:$0 sm:$0xff] (!%p1064_p4) }
 0x2fd   : > { %852 = sbr.rel (%p1064_p4) target bundleno = 776 (0x308), region = 68  ;;  %v860_v55 = vmul.f32 (!%p1064_p4), %v1065_v53, %v1780_v14  ;;  %v861_v45 = vmul.f32 (!%p1064_p4), %v1065_v53, %v1788_v18  ;;  %v862_v56 = vmul.f32 (!%p1064_p4), %v1776_v12, %v1065_v53  ;;  %v863_v57 = vmul.f32 (!%p1064_p4), %v1784_v16, %v1065_v53 }
 0x2fe   : > { %v864_v58 = vmul.f32 (!%p1064_p4), %v1065_v53, %v1782_v15  ;;  %v865_v59 = vmul.f32 (!%p1064_p4), %v1065_v53, %v1790_v19  ;;  %v866_v60 = vmul.f32 (!%p1064_p4), %v1778_v13, %v1065_v53  ;;  %v867_v14 = vmul.f32 (!%p1064_p4), %v1786_v17, %v1065_v53 }
 0x301   : > { %v1066_v54 = vld [vmem:[#allocation4] ss:$0 sm:$0xff] (!%p1064_p4) }
 0x302   : > { %v875_v18 = vadd.f32 (!%p1064_p4), %v1066_v54, %v860_v55  ;;  %v876_v61 = vadd.f32 (!%p1064_p4), %v1066_v54, %v861_v45  ;;  %v877_v62 = vadd.f32 (!%p1064_p4), %v1066_v54, %v862_v56  ;;  %v878_v12 = vadd.f32 (!%p1064_p4), %v1066_v54, %v863_v57 }
 0x303   : > { %v879_v63 = vadd.f32 (!%p1064_p4), %v1066_v54, %v864_v58  ;;  %v880_v0 = vadd.f32 (!%p1064_p4), %v1066_v54, %v865_v59  ;;  %v881_v16 = vadd.f32 (!%p1064_p4), %v1066_v54, %v866_v60  ;;  %v882_v1 = vadd.f32 (!%p1064_p4), %v1066_v54, %v867_v14 }
 0x304   : > { %883 = vst [vmem:[%s1793_s7] sm:$0xff] %v875_v18  ;;  %884 = vst [vmem:[%s1793_s7 + $0x8] sm:$0xff] %v876_v61 }
 0x305   : > { %885 = vst [vmem:[%s1793_s7 + $0x10] sm:$0xff] %v877_v62  ;;  %886 = vst [vmem:[%s1793_s7 + $0x18] sm:$0xff] %v878_v12 }
 0x306   : > { %887 = vst [vmem:[%s1793_s7 + $0x20] sm:$0xff] %v879_v63  ;;  %888 = vst [vmem:[%s1793_s7 + $0x28] sm:$0xff] %v880_v0 }
 0x307   : > { %889 = vst [vmem:[%s1793_s7 + $0x30] sm:$0xff] %v881_v16  ;;  %890 = vst [vmem:[%s1793_s7 + $0x38] sm:$0xff] %v882_v1 }
 0x308 PF: > { %s2064_s20 = sld [smem:[#allocation12_spill]]  ;;  %s899_s27 = smul.u32 %s1490_s30, %s1494_s8 }
 0x309   : > { %s908_s16 = sshll.u32 %s1793_s7, 4  ;;  %s2065_s3 = sld [smem:[#allocation21_spill]]  ;;  %s1946_s16 = int_to_ptr.vmem [resolvable:$true] %s908_s16 }
 0x30a   : > { %s1068_s19 = sshll.u32 %s899_s27, 3  ;;  %s1955_s15 = scalar_lea.sflag [#allocation7], %s321_s4 }
 0x30b   : > { %s1376_s0 = scalar_lea.vmem %s1946_s16, 1024  ;;  %p2066_p3 = scmp.ne.s32.totalorder %s2055_s17, 0 }
 0x30c   : > { %p1377_p1 = scmp.ne.s32.totalorder %s1946_s16, %s1376_s0  ;;  %s1526_s30 = smov [#allocation8]  }
 0x30d   : > { %s1380_s8 = sshll.u32 %s1526_s30, 4  ;;  %s1381_s8 = int_to_ptr.vmem [resolvable:$false] %s1380_s8 }
 0x30e   : > { %s1069_s9 = sshll.u32 %s2064_s20, 5  ;;  %p1378_p6 = pnand %p1377_p1, %p2066_p3 }
 0x30f   : > { %s905_s22 = sadd.s32 %s1069_s9, %s1068_s19  ;;  %s1382_s7 = scalar_lea.vmem %s1381_s8, 2048 }
 0x310   : > { %s1070_s29 = sshll.u32 %s905_s22, 7  ;;  %p1379_p8 = pneg %p1378_p6 }
 0x311   : > { %s1951_s21 = scalar_lea.hbm %s2065_s3, %s1070_s29  ;;  %p1383_p10 = scmp.lt.s32.totalorder %s1946_s16, %s1381_s8 }
 0x312   : > { %p1384_p11 = scmp.lt.s32.totalorder %s1382_s7, %s1376_s0 }
 0x314   : > { %p1385_p12 = por %p1384_p11, %p1383_p10 }
 0x316   : > { %p1386_p5 = pnand %p1385_p12, %p1379_p8 }
 0x318   : > { %1389 = shalt.err (!%p1386_p5)
}
 0x319   : > { %s1390_s4 = scalar_lea.hbm %s1951_s21, 1024  ;;  %s1394_s9 = scalar_lea.hbm %s2065_s3, 8192 }
 0x31a   : > { %p1391_p9 = scmp.ne.s32.totalorder %s1951_s21, %s1390_s4  ;;  %p1395_p0 = scmp.lt.u32.totalorder %s1951_s21, %s2065_s3 }
 0x31b   : > { %p1396_p2 = scmp.lt.u32.totalorder %s1394_s9, %s1390_s4  ;;  %p1398_p1 = scmp.lt.u32.totalorder %s1390_s4, %s1951_s21 }
 0x31c   : > { %p1392_p13 = pnand %p1391_p9, %p2066_p3 }
 0x31d   : > { %p1397_p4 = por %p1396_p2, %p1395_p0 }
 0x31e   : > { %p1393_p7 = pneg %p1392_p13 }
 0x31f   : > { %p1399_p6 = por %p1398_p1, %p1397_p4 }
 0x321   : > { %p1400_p8 = pnand %p1399_p6, %p1393_p7 }
 0x323   : > { %1403 = shalt.err (!%p1400_p8)
}
 0x324   : > { %s1527_s0 = smov 128   ;;  %s1528_s29 = smov 8  }
 0x325   : > { %1203 = dma.vmem_to_hbm [thread:$0]  (%p2066_p3), %s1946_s16, 1024, %s1951_s21, %s1955_s15, %s1527_s0, %s1527_s0, %s1528_s29  }
 0x326 PF: > { %p1214_p10 = scmp.ge.s32.totalorder %s1514_s13, 2  ;;  %s923_s18 = sand.u32 1, %s1466_s24  }
 0x327   : > { %p2067_p11 = scmp.ne.s32.totalorder %s2059_s14, 0  ;;  %s924_s11 = scalar_lea.sflag [#allocation7], %s923_s18 }
 0x329   : > { %p1210_p12 = pnand %p1214_p10, %p2067_p11 }
 0x32b   : > { %1461 = dma.done.wait (!%p1210_p12), %s924_s11, 1024  }
 0x32c   : > { %1463 = vsyncadd (!%p1210_p12), %s924_s11, 4294966272  ;;  %s23_s13 = sadd.s32 1, %s1514_s13   ;;  %s2069_s17 = sld [smem:[#allocation11_spill]] }
 0x32d   : > { %p1984_p5 = scmp.ge.s32.totalorder %s23_s13, 18   ;;  %s2070_s29 = sld [smem:[#allocation17_spill]] }
 0x32e   : > { %s2071_s8 = sld [smem:[#allocation13_spill]]  ;;  %s2072_s14 = sld [smem:[#allocation14_spill]] }
 0x32f   : > { %s2073_s11 = sld [smem:[#allocation15_spill]]  ;;  %s2074_s16 = sld [smem:[#allocation16_spill]] }
 0x330   : > { %s2076_s24 = smov %s1470_s25  ;;  %s2077_s25 = smov %s1474_s26 }
 0x331   : > { %s2078_s26 = smov %s1683_s23  ;;  %s2079_s27 = smov %s1482_s28 }
 0x332   : > { %s2080_s28 = smov %s2069_s17  ;;  %s2081_s30 = smov %s1502_s10 }
 0x333   : > { %s2082_s9 = smov %s1510_s12  ;;  %22 = sbr.rel (!%p1984_p5) target bundleno = 15 (0xf), region = 109 }
 0x334   : > { %s2083_s10 = smov %s2072_s14 }
 0x335   : > { %s2084_s12 = smov %s2074_s16 }
 0x33a   :  { %929 = vsyncpa [#allocation6], 1 }
 0x33b   :  { %931 = vsyncpa [#allocation6 + $0x1], 1 }
 0x33c   :  { %932 = vsyncpa [#allocation7], 1 }
 0x33d   :  { %934 = vsyncpa [#allocation7 + $0x1], 1 }

</bundles_post_ra>
